<compile_context>
chip_gen: v7x
topology: tpu7x:2x2x1
jax: 0.10.0
libtpu: 0.0.40
codegen_flags: <defaults>
</compile_context>

<pallas_src>
import jax
import jax.numpy as jnp
from jax.experimental import pallas as pl
from jax.experimental.pallas import tpu as pltpu

BN_EPS = 1e-5


def _round_up(x, m):
    return ((x + m - 1) // m) * m


# ---------------------------------------------------------------------------
# Kernels
# ---------------------------------------------------------------------------

def _stats1_kernel(x_ref, w1_ref, s1_ref, s2_ref):
    """Per-tile partial sum / sum-of-squares of h1 = x @ W1."""
    h = jnp.dot(x_ref[...], w1_ref[...], preferred_element_type=jnp.float32)
    # Padded x rows are zero -> h rows are zero -> contribute nothing. No mask.
    s1_ref[0] = jnp.sum(h, axis=0, keepdims=True)
    s2_ref[0] = jnp.sum(h * h, axis=0, keepdims=True)


def _stats2_kernel(x_ref, w1_ref, sc1_ref, sh1_ref, w2_ref, s1_ref, s2_ref):
    """Per-tile partial sum / sum-of-squares of h2 = relu(bn1(x @ W1)) @ W2."""
    h1 = jnp.dot(x_ref[...], w1_ref[...], preferred_element_type=jnp.float32)
    a1 = jnp.maximum(h1 * sc1_ref[...] + sh1_ref[...], 0.0)
    h2 = jnp.dot(a1, w2_ref[...], preferred_element_type=jnp.float32)
    # Padded rows contribute pad * relu(shift1) @ W2; corrected in the wrapper.
    s1_ref[0] = jnp.sum(h2, axis=0, keepdims=True)
    s2_ref[0] = jnp.sum(h2 * h2, axis=0, keepdims=True)


def _forward_kernel(x_ref, w1_ref, sc1_ref, sh1_ref, w2_ref, sc2_ref, sh2_ref,
                    w3_ref, b3_ref, out_ref):
    """Fused [Linear -> folded-BN -> ReLU] x2 -> Linear(+bias) for one row tile."""
    h1 = jnp.dot(x_ref[...], w1_ref[...], preferred_element_type=jnp.float32)
    a1 = jnp.maximum(h1 * sc1_ref[...] + sh1_ref[...], 0.0)
    h2 = jnp.dot(a1, w2_ref[...], preferred_element_type=jnp.float32)
    a2 = jnp.maximum(h2 * sc2_ref[...] + sh2_ref[...], 0.0)
    out = jnp.dot(a2, w3_ref[...], preferred_element_type=jnp.float32) + b3_ref[...]
    out_ref[...] = out.astype(out_ref.dtype)


# ---------------------------------------------------------------------------
# Wrapper
# ---------------------------------------------------------------------------

def _fold_bn(s1, s2, gamma, beta, n_true):
    """Turn batch sums into a single per-channel scale/shift (train-mode BN)."""
    mean = s1 / n_true
    var = jnp.maximum(s2 / n_true - mean * mean, 0.0)
    scale = gamma * jax.lax.rsqrt(var + BN_EPS)
    shift = beta - mean * scale
    return scale, shift


def point_fc_head(x, params, *, tile_n=4096):
    """Fused FC head.  x: (N, C_in) float32.  Returns (N, num_class) float32."""
    n, c_in = x.shape
    c1 = params["w1"].shape[1]
    c2 = params["w2"].shape[1]
    num_class = params["w3"].shape[1]

    # Row tile: multiple of 8 sublanes, no larger than the (padded) batch.
    # Keep tile_n <= ~16384 on v7x (smaller physical VMEM); with the narrow
    # 8-lane output even 8192 is only a few MiB double-buffered.
    tile_n = max(8, min(_round_up(tile_n, 8), _round_up(n, 8)))
    n_pad = _round_up(n, tile_n)
    num_tiles = n_pad // tile_n
    pad_rows = n_pad - n
    out_pad = max(8, _round_up(num_class, 8))   # narrow, not 128 (write traffic)

    x_p = x if pad_rows == 0 else jnp.pad(x, ((0, pad_rows), (0, 0)))
    w3_p = jnp.pad(params["w3"], ((0, 0), (0, out_pad - num_class)))
    b3_p = jnp.pad(params["b3"], ((0, 0), (0, out_pad - num_class)))

    x_spec = pl.BlockSpec((tile_n, c_in), lambda t: (t, 0))

    def const2(shape):
        # Resident parameter: constant block index -> DMA'd once for the whole grid.
        return pl.BlockSpec(shape, lambda t: (0, 0))

    def part_spec(c):
        # Per-tile partial statistics, (num_tiles, 1, c) so tile axis is parallel.
        return pl.BlockSpec((1, 1, c), lambda t: (t, 0, 0))

    parallel = pltpu.CompilerParams(dimension_semantics=("parallel",))

    f_mm1 = 2 * n_pad * c_in * c1
    f_mm2 = 2 * n_pad * c1 * c2
    f_mm3 = 2 * n_pad * c2 * out_pad
    bytes_x = n_pad * c_in * 4
    bytes_w = (c_in * c1 + c1 * c2 + c2 * out_pad + 2 * (c1 + c2) + out_pad) * 4

    # ---- pass 1: layer-1 BN statistics (partial sums per tile) -------------
    ps1_sum, ps1_sq = pl.pallas_call(
        _stats1_kernel,
        out_shape=(jax.ShapeDtypeStruct((num_tiles, 1, c1), jnp.float32),
                   jax.ShapeDtypeStruct((num_tiles, 1, c1), jnp.float32)),
        grid=(num_tiles,),
        in_specs=[x_spec, const2((c_in, c1))],
        out_specs=(part_spec(c1), part_spec(c1)),
        compiler_params=parallel,
        cost_estimate=pl.CostEstimate(
            flops=f_mm1 + 3 * n_pad * c1, transcendentals=0,
            bytes_accessed=bytes_x + c_in * c1 * 4 + 2 * num_tiles * c1 * 4),
    )(x_p, params["w1"])
    s1a = jnp.sum(ps1_sum[:, 0, :], axis=0, keepdims=True)
    s2a = jnp.sum(ps1_sq[:, 0, :], axis=0, keepdims=True)
    scale1, shift1 = _fold_bn(s1a, s2a, params["g1"], params["b1"], n)

    # ---- pass 2: layer-2 BN statistics --------------------------------------
    ps2_sum, ps2_sq = pl.pallas_call(
        _stats2_kernel,
        out_shape=(jax.ShapeDtypeStruct((num_tiles, 1, c2), jnp.float32),
                   jax.ShapeDtypeStruct((num_tiles, 1, c2), jnp.float32)),
        grid=(num_tiles,),
        in_specs=[x_spec, const2((c_in, c1)), const2((1, c1)), const2((1, c1)),
                  const2((c1, c2))],
        out_specs=(part_spec(c2), part_spec(c2)),
        compiler_params=parallel,
        cost_estimate=pl.CostEstimate(
            flops=f_mm1 + f_mm2 + n_pad * (3 * c1 + 3 * c2), transcendentals=0,
            bytes_accessed=bytes_x + bytes_w + 2 * num_tiles * c2 * 4),
    )(x_p, params["w1"], scale1, shift1, params["w2"])
    s1b = jnp.sum(ps2_sum[:, 0, :], axis=0, keepdims=True)
    s2b = jnp.sum(ps2_sq[:, 0, :], axis=0, keepdims=True)
    if pad_rows > 0:
        # Padded (zero) x rows become a1 = relu(shift1) after layer-1 BN, which is
        # generally nonzero; subtract their exact layer-2 contribution here instead
        # of masking every tile inside the kernel.
        h2_pad = jnp.maximum(shift1, 0.0) @ params["w2"]        # (1, c2)
        s1b = s1b - pad_rows * h2_pad
        s2b = s2b - pad_rows * h2_pad * h2_pad
    scale2, shift2 = _fold_bn(s1b, s2b, params["g2"], params["b2"], n)

    # ---- pass 3: fused forward ----------------------------------------------
    out_padded = pl.pallas_call(
        _forward_kernel,
        out_shape=jax.ShapeDtypeStruct((n_pad, out_pad), jnp.float32),
        grid=(num_tiles,),
        in_specs=[x_spec, const2((c_in, c1)), const2((1, c1)), const2((1, c1)),
                  const2((c1, c2)), const2((1, c2)), const2((1, c2)),
                  const2((c2, out_pad)), const2((1, out_pad))],
        out_specs=pl.BlockSpec((tile_n, out_pad), lambda t: (t, 0)),
        compiler_params=parallel,
        cost_estimate=pl.CostEstimate(
            flops=f_mm1 + f_mm2 + f_mm3 + n_pad * (3 * c1 + 3 * c2 + out_pad),
            transcendentals=0,
            bytes_accessed=bytes_x + n_pad * out_pad * 4 + bytes_w),
    )(x_p, params["w1"], scale1, shift1, params["w2"], scale2, shift2, w3_p, b3_p)

    return out_padded[:n, :num_class]


# ---------------------------------------------------------------------------
# Parameters / reference
# ---------------------------------------------------------------------------

def init_params(key, c_in, fc_cfg, num_class):
    """Deterministic synthetic parameters matching make_fc_layers shapes."""
    k = jax.random.split(key, 4)
    c1, c2 = fc_cfg
    return {
        # nn.Linear stores (out, in); we pre-transpose to (in, out).
        "w1": jax.random.normal(k[0], (c_in, c1), jnp.float32) * 0.1,
        "g1": jnp.ones((1, c1), jnp.float32),    # BatchNorm1d gamma
        "b1": jnp.zeros((1, c1), jnp.float32),   # BatchNorm1d beta
        "w2": jax.random.normal(k[1], (c1, c2), jnp.float32) * 0.1,
        "g2": jnp.ones((1, c2), jnp.float32),
        "b2": jnp.zeros((1, c2), jnp.float32),
        "w3": jax.random.normal(k[2], (c2, num_class), jnp.float32) * 0.1,
        "b3": jax.random.normal(k[3], (1, num_class), jnp.float32) * 0.1,
    }


def _reference(x, params):
    """Pure-JAX reference of the fused head (train-mode BatchNorm1d)."""
    def lin_bn_relu(h, w, g, b):
        h = h @ w
        mean = jnp.mean(h, axis=0, keepdims=True)
        var = jnp.mean((h - mean) ** 2, axis=0, keepdims=True)
        h = (h - mean) * jax.lax.rsqrt(var + BN_EPS)
        return jnp.maximum(h * g + b, 0.0)

    h = lin_bn_relu(x, params["w1"], params["g1"], params["b1"])
    h = lin_bn_relu(h, params["w2"], params["g2"], params["b2"])
    return h @ params["w3"] + params["b3"]


if __name__ == "__main__":
    key = jax.random.PRNGKey(0)
    kx, kp = jax.random.split(key)

    N, C_IN = 300, 32          # per-point feature vectors (N not a multiple of 8)
    FC_CFG = (32, 32)          # fc_cfg from model_cfg
    NUM_CLASS = 3              # output_channels of the head

    x = jax.random.normal(kx, (N, C_IN), jnp.float32)
    params = init_params(kp, C_IN, FC_CFG, NUM_CLASS)
    ref = _reference(x, params)

    # Default tile (single tile here; production N uses tile_n=4096).
    out = point_fc_head(x, params)
    jax.block_until_ready(out)
    assert out.shape == (N, NUM_CLASS)
    assert out.dtype == jnp.float32
    assert jnp.allclose(out, ref, rtol=5e-3, atol=5e-3), "mismatch vs reference"

    # Multi-tile path: 3 row tiles, padded last tile -> exercises the parallel
    # grid and the wrapper-side padded-row statistics correction.
    out2 = point_fc_head(x, params, tile_n=128)
    jax.block_until_ready(out2)
    assert jnp.allclose(out2, ref, rtol=5e-3, atol=5e-3), "mismatch (multi-tile)"

    print("KERNEL_OK")
</pallas_src>

<mosaic_0001>
module attributes {stable_mosaic.version = 11 : i64} {
  func.func @_stats1_kernel(%arg0: i32, %arg1: memref<304x32xf32, #tpu.memory_space<vmem>>, %arg2: memref<32x32xf32, #tpu.memory_space<vmem>>, %arg3: memref<1x1x32xf32, #tpu.memory_space<vmem>>, %arg4: memref<1x1x32xf32, #tpu.memory_space<vmem>>) attributes {dimension_semantics = [#tpu.dimension_semantics<parallel>], iteration_bounds = array<i64: 1>, scalar_prefetch = 0 : i64, scratch_operands = 0 : i64, tpu.core_type = #tpu.core_type<tc>, window_params = [{transform_indices = @transform_0, window_bounds = array<i64: 304, 32>}, {pipeline_mode = #tpu.pipeline_mode<synchronous>, transform_indices = @transform_1, window_bounds = array<i64: 32, 32>}, {transform_indices = @transform_2, window_bounds = array<i64: 1, 1, 32>}, {transform_indices = @transform_3, window_bounds = array<i64: 1, 1, 32>}]} {
    %c0 = arith.constant 0 : index
    %c0_0 = arith.constant 0 : index
    %0 = vector.load %arg1[%c0, %c0_0] : memref<304x32xf32, #tpu.memory_space<vmem>>, vector<304x32xf32>
    %c0_1 = arith.constant 0 : index
    %c0_2 = arith.constant 0 : index
    %1 = vector.load %arg2[%c0_1, %c0_2] : memref<32x32xf32, #tpu.memory_space<vmem>>, vector<32x32xf32>
    %cst = arith.constant dense<0.000000e+00> : vector<304x32xf32>
    %2 = tpu.matmul %0, %1, %cst {dimension_numbers = #tpu.dot_dimension_numbers<[1], [0], [0], [1], [0, 0, 1, 1], [], []>} : vector<304x32xf32>, vector<32x32xf32>, vector<304x32xf32> -> vector<304x32xf32>
    %cst_3 = arith.constant dense<0.000000e+00> : vector<32xf32>
    %3 = vector.multi_reduction <add>, %2, %cst_3 [0] : vector<304x32xf32> to vector<32xf32>
    %4 = vector.shape_cast %3 : vector<32xf32> to vector<1x32xf32>
    %c0_4 = arith.constant 0 : index
    %c0_5 = arith.constant 0 : index
    %c0_6 = arith.constant 0 : index
    %5 = vector.load %arg3[%c0_4, %c0_5, %c0_6] : memref<1x1x32xf32, #tpu.memory_space<vmem>>, vector<1x1x32xf32>
    %6 = vector.shape_cast %5 : vector<1x1x32xf32> to vector<1x32xf32>
    %7 = vector.shape_cast %4 : vector<1x32xf32> to vector<1x1x32xf32>
    tpu.vector_store %arg3[%c0_4, %c0_5, %c0_6], %7 {strides = array<i32>} : memref<1x1x32xf32, #tpu.memory_space<vmem>>, vector<1x1x32xf32>,
    %8 = arith.mulf %2, %2 : vector<304x32xf32>
    %cst_7 = arith.constant dense<0.000000e+00> : vector<32xf32>
    %9 = vector.multi_reduction <add>, %8, %cst_7 [0] : vector<304x32xf32> to vector<32xf32>
    %10 = vector.shape_cast %9 : vector<32xf32> to vector<1x32xf32>
    %c0_8 = arith.constant 0 : index
    %c0_9 = arith.constant 0 : index
    %c0_10 = arith.constant 0 : index
    %11 = vector.load %arg4[%c0_8, %c0_9, %c0_10] : memref<1x1x32xf32, #tpu.memory_space<vmem>>, vector<1x1x32xf32>
    %12 = vector.shape_cast %11 : vector<1x1x32xf32> to vector<1x32xf32>
    %13 = vector.shape_cast %10 : vector<1x32xf32> to vector<1x1x32xf32>
    tpu.vector_store %arg4[%c0_8, %c0_9, %c0_10], %13 {strides = array<i32>} : memref<1x1x32xf32, #tpu.memory_space<vmem>>, vector<1x1x32xf32>,
    return
  }
  func.func @transform_0(%arg0: i32) -> (i32, i32) {
    %c0_i32 = arith.constant 0 : i32
    %c0_i32_0 = arith.constant 0 : i32
    return %arg0, %c0_i32 : i32, i32
  }
  func.func @transform_1(%arg0: i32) -> (i32, i32) {
    %c0_i32 = arith.constant 0 : i32
    %c0_i32_0 = arith.constant 0 : i32
    %c0_i32_1 = arith.constant 0 : i32
    return %c0_i32, %c0_i32_0 : i32, i32
  }
  func.func @transform_2(%arg0: i32) -> (i32, i32, i32) {
    %c0_i32 = arith.constant 0 : i32
    %c0_i32_0 = arith.constant 0 : i32
    %c0_i32_1 = arith.constant 0 : i32
    return %arg0, %c0_i32, %c0_i32_0 : i32, i32, i32
  }
  func.func @transform_3(%arg0: i32) -> (i32, i32, i32) {
    %c0_i32 = arith.constant 0 : i32
    %c0_i32_0 = arith.constant 0 : i32
    %c0_i32_1 = arith.constant 0 : i32
    return %arg0, %c0_i32, %c0_i32_0 : i32, i32, i32
  }
}

</mosaic_0001>

<bundles_post_ra>
// kernel: tpu_custom_call.1
= control target key start
LH: loop header
LB: loop body
LE: loop exit
PB: predicated region body
PF: predicated region fallthrough
CT: control target
= control target key end

     0   :  { %9 = vsyncpa [#allocation3], 0  ;;  %vm57_vm0 = vcmask 261120   ;;  %s1251_s0 = inlined_call_operand.vmem [shape: f32[304,32], index: 0, kind: input, shape index: {}]   ;;  %s1252_s1 = inlined_call_operand.vmem [shape: f32[32,32], index: 1, kind: input, shape index: {}]   ;;  %s1253_s2 = inlined_call_operand.hbm [shape: f32[1,1,32], index: 2, kind: output, shape index: {0}]   ;;  %s1254_s3 = inlined_call_operand.hbm [shape: f32[1,1,32], index: 3, kind: output, shape index: {1}]  }
   0x1   :  { %v53_v0 = vld [vmem:[%s1252_s1] sm:$0xff]  ;;  %v54_v1 = vld [vmem:[%s1252_s1 + $0x8] sm:$0xff]  ;;  %v55_v2 = vld [vmem:[%s1252_s1 + $0x10] sm:$0xff] }
   0x2   :  { %v803_v3 = vpack.c.bf16 %v54_v1, %v53_v0  ;;  %v56_v4 = vld [vmem:[%s1252_s1 + $0x18] sm:$0xff]  ;;  %v15_v5 = vld [vmem:[%s1251_s0] sm:$0xff]  ;;  %v16_v7 = vld [vmem:[%s1251_s0 + $0x8] sm:$0xff] }
   0x3   :  { %v807_v6 = vpack.c.bf16 %v56_v4, %v55_v2  ;;  %746 = vmatprep.mubr.msk.f32.mxu0 %vm57_vm0, %v15_v5  ;;  %v35_v8 = vld [vmem:[%s1251_s0 + $0xa0] sm:$0xff]  ;;  %v36_v9 = vld [vmem:[%s1251_s0 + $0xa8] sm:$0xff]  ;;  %v17_v10 = vld [vmem:[%s1251_s0 + $0x10] sm:$0xff] }
   0x4   :  { %804 = vmatprep.subr.bf16.mxu0 %v803_v3  ;;  %811 = vmatprep.subr.bf16.mxu1 %v803_v3  ;;  %v37_v11 = vld [vmem:[%s1251_s0 + $0xb0] sm:$0xff]  ;;  %v18_v12 = vld [vmem:[%s1251_s0 + $0x18] sm:$0xff]  ;;  %v19_v14 = vld [vmem:[%s1251_s0 + $0x20] sm:$0xff] }
   0x5   :  { %806 = vmatpush3.bf16.msra.mxu0 %v803_v3  ;;  %813 = vmatpush3.bf16.msra.mxu1 %v803_v3  ;;  %v38_v13 = vld [vmem:[%s1251_s0 + $0xb8] sm:$0xff]  ;;  %v39_v15 = vld [vmem:[%s1251_s0 + $0xc0] sm:$0xff] }
   0x6   :  { %808 = vmatprep.subr.bf16.mxu0 %v807_v6  ;;  %812 = vmatprep.subr.bf16.mxu1 %v807_v6 }
   0x7   :  { %776 = vmatprep.mubr.msk.f32.mxu1 %vm57_vm0, %v35_v8 }
   0x9   :  { %810 = vmatpush3.bf16.msra.mxu0 %v807_v6  ;;  %814 = vmatpush3.bf16.msra.mxu1 %v807_v6 }
   0xc   :  { %747 = vmatmul.mubr.msk.f32.vlgmr.msra.gmra.mrb[0].mxu0 %vm57_vm0, %v16_v7  ;;  %777 = vmatmul.mubr.msk.f32.vlgmr.msra.gmra.mrb[0].mxu1 %vm57_vm0, %v36_v9 }
   0xd   :  { %749 = vmatprep.mubr.msk.f32.mxu0 %vm57_vm0, %v17_v10  ;;  %779 = vmatprep.mubr.msk.f32.mxu1 %vm57_vm0, %v37_v11 }
   0xe   :  { %10 = vsyncpa [#allocation5], 0  ;;  %v20_v16 = vld [vmem:[%s1251_s0 + $0x28] sm:$0xff]  ;;  %v21_v18 = vld [vmem:[%s1251_s0 + $0x30] sm:$0xff]  ;;  %vm508_vm1 = vcmask 253952   ;;  %s866_s13 = smov [#allocation4]  }
   0xf   :  { %v40_v17 = vld [vmem:[%s1251_s0 + $0xc8] sm:$0xff]  ;;  %v41_v19 = vld [vmem:[%s1251_s0 + $0xd0] sm:$0xff]  ;;  %v22_v20 = vld [vmem:[%s1251_s0 + $0x38] sm:$0xff]  ;;  %s646_s14 = sshll.u32 %s866_s13, 4  ;;  %s1218_s14 = int_to_ptr.vmem [resolvable:$true] %s646_s14 }
  0x10   :  { %750 = vmatmul.mubr.msk.f32.gmra.mrb[2].mxu0 %vm57_vm0, %v18_v12  ;;  %780 = vmatmul.mubr.msk.f32.gmra.mrb[2].mxu1 %vm57_vm0, %v38_v13  ;;  %v42_v21 = vld [vmem:[%s1251_s0 + $0xd8] sm:$0xff]  ;;  %v23_v22 = vld [vmem:[%s1251_s0 + $0x40] sm:$0xff]  ;;  %v24_v24 = vld [vmem:[%s1251_s0 + $0x48] sm:$0xff] }
  0x11   :  { %752 = vmatprep.mubr.msk.f32.mxu0 %vm57_vm0, %v19_v14  ;;  %782 = vmatprep.mubr.msk.f32.mxu1 %vm57_vm0, %v39_v15  ;;  %v43_v23 = vld [vmem:[%s1251_s0 + $0xe0] sm:$0xff]  ;;  %v44_v25 = vld [vmem:[%s1251_s0 + $0xe8] sm:$0xff]  ;;  %v25_v26 = vld [vmem:[%s1251_s0 + $0x50] sm:$0xff] }
  0x12   :  { %v45_v27 = vld [vmem:[%s1251_s0 + $0xf0] sm:$0xff]  ;;  %v26_v28 = vld [vmem:[%s1251_s0 + $0x58] sm:$0xff]  ;;  %v27_v30 = vld [vmem:[%s1251_s0 + $0x60] sm:$0xff] }
  0x13   :  { %v46_v29 = vld [vmem:[%s1251_s0 + $0xf8] sm:$0xff]  ;;  %v47_v31 = vld [vmem:[%s1251_s0 + $0x100] sm:$0xff]  ;;  %v28_v32 = vld [vmem:[%s1251_s0 + $0x68] sm:$0xff] }
  0x14   :  { %753 = vmatmul.mubr.msk.f32.gmra.mrb[4].mxu0 %vm57_vm0, %v20_v16  ;;  %783 = vmatmul.mubr.msk.f32.gmra.mrb[4].mxu1 %vm57_vm0, %v40_v17  ;;  %v48_v33 = vld [vmem:[%s1251_s0 + $0x108] sm:$0xff]  ;;  %v29_v34 = vld [vmem:[%s1251_s0 + $0x70] sm:$0xff]  ;;  %v30_v36 = vld [vmem:[%s1251_s0 + $0x78] sm:$0xff] }
  0x15   :  { %755 = vmatprep.mubr.msk.f32.mxu0 %vm57_vm0, %v21_v18  ;;  %785 = vmatprep.mubr.msk.f32.mxu1 %vm57_vm0, %v41_v19  ;;  %v49_v35 = vld [vmem:[%s1251_s0 + $0x110] sm:$0xff]  ;;  %v50_v37 = vld [vmem:[%s1251_s0 + $0x118] sm:$0xff]  ;;  %v31_v38 = vld [vmem:[%s1251_s0 + $0x80] sm:$0xff] }
  0x16   :  { %v51_v39 = vld [vmem:[%s1251_s0 + $0x120] sm:$0xff]  ;;  %v32_v40 = vld [vmem:[%s1251_s0 + $0x88] sm:$0xff]  ;;  %v33_v42 = vld [vmem:[%s1251_s0 + $0x90] sm:$0xff] }
  0x17   :  { %v52_v41 = vld [vmem:[%s1251_s0 + $0x128] sm:$0xff]  ;;  %v34_v43 = vld [vmem:[%s1251_s0 + $0x98] sm:$0xff]  ;;  %s865_s0 = smov [#allocation2]  }
  0x18   :  { %756 = vmatmul.mubr.msk.f32.gmra.mrb[6].mxu0 %vm57_vm0, %v22_v20  ;;  %786 = vmatmul.mubr.msk.f32.gmra.mrb[6].mxu1 %vm57_vm0, %v42_v21  ;;  %s636_s12 = sshll.u32 %s865_s0, 4  ;;  %s637_s12 = int_to_ptr.vmem [resolvable:$true] %s636_s12 }
  0x19   :  { %758 = vmatprep.mubr.msk.f32.mxu0 %vm57_vm0, %v23_v22  ;;  %788 = vmatprep.mubr.msk.f32.mxu1 %vm57_vm0, %v43_v23  ;;  %s817_s15 = scalar_lea.vmem %s637_s12, 16  ;;  %s821_s16 = scalar_lea.vmem %s637_s12, 32 }
  0x1a   :  { %p818_p0 = scmp.ne.s32.totalorder %s637_s12, %s817_s15  ;;  %p822_p1 = scmp.lt.s32.totalorder %s637_s12, %s637_s12 }
  0x1b   :  { %p823_p2 = scmp.lt.s32.totalorder %s821_s16, %s817_s15 }
  0x1c   :  { %759 = vmatmul.mubr.msk.f32.gmra.mrb[8].mxu0 %vm57_vm0, %v24_v24  ;;  %789 = vmatmul.mubr.msk.f32.gmra.mrb[8].mxu1 %vm57_vm0, %v44_v25 }
  0x1d   :  { %761 = vmatprep.mubr.msk.f32.mxu0 %vm57_vm0, %v25_v26  ;;  %791 = vmatprep.mubr.msk.f32.mxu1 %vm57_vm0, %v45_v27  ;;  %p824_p3 = por %p823_p2, %p822_p1 }
  0x1f   :  { %p825_p4 = pnand %p824_p3, %p818_p0 }
  0x20   :  { %762 = vmatmul.mubr.msk.f32.gmra.mrb[10].mxu0 %vm57_vm0, %v26_v28  ;;  %792 = vmatmul.mubr.msk.f32.gmra.mrb[10].mxu1 %vm57_vm0, %v46_v29 }
  0x21   :  { %764 = vmatprep.mubr.msk.f32.mxu0 %vm57_vm0, %v27_v30  ;;  %794 = vmatprep.mubr.msk.f32.mxu1 %vm57_vm0, %v47_v31 }
  0x24   :  { %765 = vmatmul.mubr.msk.f32.gmra.mrb[12].mxu0 %vm57_vm0, %v28_v32  ;;  %795 = vmatmul.mubr.msk.f32.gmra.mrb[12].mxu1 %vm57_vm0, %v48_v33 }
  0x25   :  { %767 = vmatprep.mubr.msk.f32.mxu0 %vm57_vm0, %v29_v34  ;;  %797 = vmatprep.mubr.msk.f32.mxu1 %vm57_vm0, %v49_v35 }
  0x28   :  { %768 = vmatmul.mubr.msk.f32.gmra.mrb[14].mxu0 %vm57_vm0, %v30_v36  ;;  %798 = vmatmul.mubr.msk.f32.gmra.mrb[14].mxu1 %vm57_vm0, %v50_v37 }
  0x29   :  { %770 = vmatprep.mubr.msk.f32.mxu0 %vm57_vm0, %v31_v38  ;;  %800 = vmatprep.mubr.msk.f32.mxu1 %vm57_vm0, %v51_v39 }
  0x2c   :  { %771 = vmatmul.mubr.msk.f32.gmra.mrb[16].mxu0 %vm57_vm0, %v32_v40  ;;  %801 = vmatmul.mubr.msk.f32.gmra.mrb[16].mxu1 %vm57_vm0, %v52_v41 }
  0x2d   :  { %773 = vmatprep.mubr.msk.f32.mxu0 %vm57_vm0, %v33_v42 }
  0x30   :  { %774 = vmatmul.mubr.msk.f32.gmra.mrb[18].mxu0 %vm57_vm0, %v34_v43 }
  0xdf   :  { %v748_v44 = vpop.f32.mrb[0].mxu0  ;;  %v1051_v45 = vpop.f32.mrb[0].mxu1 }
  0xe0   :  { %v428_v46 = vsel %vm57_vm0, %v748_v44, 0.0  ;;  %v511_v47 = vmul.f32 %v748_v44, %v748_v44  ;;  %v238_v48 = vpop.f32.mrb[1].mxu0  ;;  %v1054_v49 = vpop.f32.mrb[1].mxu1 }
  0xe1   :  { %v427_v50 = vsel %vm57_vm0, %v238_v48, 0.0  ;;  %v510_v51 = vmul.f32 %v238_v48, %v238_v48 }
  0xe2   :  { %v549_v52 = vsel %vm57_vm0, %v511_v47, 0.0  ;;  %v429_v53 = vadd.f32 %v428_v46, %v427_v50 }
  0xe3   :  { %v548_v54 = vsel %vm57_vm0, %v510_v51, 0.0  ;;  %v751_v55 = vpop.f32.mrb[2].mxu0  ;;  %v1059_v56 = vpop.f32.mrb[2].mxu1 }
  0xe4   :  { %v550_v57 = vadd.f32 %v549_v52, %v548_v54  ;;  %v248_v58 = vpop.f32.mrb[3].mxu0  ;;  %v1061_v59 = vpop.f32.mrb[3].mxu1  ;;  %v513_v60 = vmul.f32 %v751_v55, %v751_v55  ;;  %v432_v0 = vsel %vm57_vm0, %v751_v55, 0.0 }
  0xe5   :  { %v430_v61 = vsel %vm57_vm0, %v248_v58, 0.0  ;;  %v512_v62 = vmul.f32 %v248_v58, %v248_v58 }
  0xe6   :  { %v431_v63 = vadd.f32 %v430_v61, %v429_v53  ;;  %v553_v8 = vsel %vm57_vm0, %v513_v60, 0.0 }
  0xe7   :  { %v551_v1 = vsel %vm57_vm0, %v512_v62, 0.0  ;;  %v754_v2 = vpop.f32.mrb[4].mxu0  ;;  %v1066_v3 = vpop.f32.mrb[4].mxu1 }
  0xe8   :  { %v552_v4 = vadd.f32 %v551_v1, %v550_v57  ;;  %v258_v5 = vpop.f32.mrb[5].mxu0  ;;  %v433_v6 = vadd.f32 %v432_v0, %v431_v63  ;;  %v1068_v7 = vpop.f32.mrb[5].mxu1  ;;  %v515_v9 = vmul.f32 %v754_v2, %v754_v2  ;;  %v436_v14 = vsel %vm57_vm0, %v754_v2, 0.0 }
  0xe9   :  { %v434_v10 = vsel %vm57_vm0, %v258_v5, 0.0  ;;  %v514_v11 = vmul.f32 %v258_v5, %v258_v5 }
  0xea   :  { %v435_v12 = vadd.f32 %v434_v10, %v433_v6  ;;  %v554_v13 = vadd.f32 %v553_v8, %v552_v4  ;;  %v557_v22 = vsel %vm57_vm0, %v515_v9, 0.0 }
  0xeb   :  { %v555_v15 = vsel %vm57_vm0, %v514_v11, 0.0  ;;  %v757_v16 = vpop.f32.mrb[6].mxu0  ;;  %v1074_v17 = vpop.f32.mrb[6].mxu1 }
  0xec   :  { %v556_v18 = vadd.f32 %v555_v15, %v554_v13  ;;  %v268_v19 = vpop.f32.mrb[7].mxu0  ;;  %v437_v20 = vadd.f32 %v436_v14, %v435_v12  ;;  %v1076_v21 = vpop.f32.mrb[7].mxu1  ;;  %v517_v23 = vmul.f32 %v757_v16, %v757_v16  ;;  %v440_v28 = vsel %vm57_vm0, %v757_v16, 0.0 }
  0xed   :  { %v438_v24 = vsel %vm57_vm0, %v268_v19, 0.0  ;;  %v516_v25 = vmul.f32 %v268_v19, %v268_v19 }
  0xee   :  { %v439_v26 = vadd.f32 %v438_v24, %v437_v20  ;;  %v558_v27 = vadd.f32 %v557_v22, %v556_v18  ;;  %v561_v36 = vsel %vm57_vm0, %v517_v23, 0.0 }
  0xef   :  { %v559_v29 = vsel %vm57_vm0, %v516_v25, 0.0  ;;  %v760_v30 = vpop.f32.mrb[8].mxu0  ;;  %v1082_v31 = vpop.f32.mrb[8].mxu1 }
  0xf0   :  { %v560_v32 = vadd.f32 %v559_v29, %v558_v27  ;;  %v278_v33 = vpop.f32.mrb[9].mxu0  ;;  %v441_v34 = vadd.f32 %v440_v28, %v439_v26  ;;  %v1084_v35 = vpop.f32.mrb[9].mxu1  ;;  %v519_v37 = vmul.f32 %v760_v30, %v760_v30  ;;  %v444_v42 = vsel %vm57_vm0, %v760_v30, 0.0 }
  0xf1   :  { %v442_v38 = vsel %vm57_vm0, %v278_v33, 0.0  ;;  %v518_v39 = vmul.f32 %v278_v33, %v278_v33 }
  0xf2   :  { %v443_v40 = vadd.f32 %v442_v38, %v441_v34  ;;  %v562_v41 = vadd.f32 %v561_v36, %v560_v32  ;;  %v565_v52 = vsel %vm57_vm0, %v519_v37, 0.0 }
  0xf3   :  { %v563_v43 = vsel %vm57_vm0, %v518_v39, 0.0  ;;  %v763_v44 = vpop.f32.mrb[10].mxu0  ;;  %v1090_v46 = vpop.f32.mrb[10].mxu1 }
  0xf4   :  { %v564_v47 = vadd.f32 %v563_v43, %v562_v41  ;;  %v288_v48 = vpop.f32.mrb[11].mxu0  ;;  %v445_v50 = vadd.f32 %v444_v42, %v443_v40  ;;  %v1092_v51 = vpop.f32.mrb[11].mxu1  ;;  %v521_v53 = vmul.f32 %v763_v44, %v763_v44  ;;  %v448_v60 = vsel %vm57_vm0, %v763_v44, 0.0 }
  0xf5   :  { %v446_v54 = vsel %vm57_vm0, %v288_v48, 0.0  ;;  %v520_v55 = vmul.f32 %v288_v48, %v288_v48 }
  0xf6   :  { %v447_v57 = vadd.f32 %v446_v54, %v445_v50  ;;  %v566_v58 = vadd.f32 %v565_v52, %v564_v47  ;;  %v569_v5 = vsel %vm57_vm0, %v521_v53, 0.0  ;;  %v530_v54 = vmul.f32 %v1054_v49, %v1054_v49 }
  0xf7   :  { %v567_v61 = vsel %vm57_vm0, %v520_v55, 0.0  ;;  %v766_v62 = vpop.f32.mrb[12].mxu0  ;;  %v1098_v63 = vpop.f32.mrb[12].mxu1 }
  0xf8   :  { %v568_v0 = vadd.f32 %v567_v61, %v566_v58  ;;  %v298_v1 = vpop.f32.mrb[13].mxu0  ;;  %v449_v2 = vadd.f32 %v448_v60, %v447_v57  ;;  %v1100_v4 = vpop.f32.mrb[13].mxu1  ;;  %v523_v6 = vmul.f32 %v766_v62, %v766_v62  ;;  %v452_v12 = vsel %vm57_vm0, %v766_v62, 0.0 }
  0xf9   :  { %v450_v8 = vsel %vm57_vm0, %v298_v1, 0.0  ;;  %v522_v9 = vmul.f32 %v298_v1, %v298_v1 }
  0xfa   :  { %v451_v10 = vadd.f32 %v450_v8, %v449_v2  ;;  %v570_v11 = vadd.f32 %v569_v5, %v568_v0  ;;  %v573_v22 = vsel %vm57_vm0, %v523_v6, 0.0  ;;  %v466_v2 = vsel %vm57_vm0, %v1054_v49, 0.0 }
  0xfb   :  { %v571_v13 = vsel %vm57_vm0, %v522_v9, 0.0  ;;  %v769_v14 = vpop.f32.mrb[14].mxu0  ;;  %v1106_v15 = vpop.f32.mrb[14].mxu1  ;;  %v531_v9 = vmul.f32 %v1051_v45, %v1051_v45  ;;  %v470_v49 = vsel %vm57_vm0, %v1061_v59, 0.0 }
  0xfc   :  { %v572_v16 = vadd.f32 %v571_v13, %v570_v11  ;;  %v308_v18 = vpop.f32.mrb[15].mxu0  ;;  %v453_v19 = vadd.f32 %v452_v12, %v451_v10  ;;  %v1108_v20 = vpop.f32.mrb[15].mxu1  ;;  %v525_v23 = vmul.f32 %v769_v14, %v769_v14  ;;  %v456_v28 = vsel %vm57_vm0, %v769_v14, 0.0 }
  0xfd   :  { %v454_v24 = vsel %vm57_vm0, %v308_v18, 0.0  ;;  %v524_v25 = vmul.f32 %v308_v18, %v308_v18  ;;  %v587_v10 = vsel %vm57_vm0, %v530_v54, 0.0  ;;  %v532_v11 = vmul.f32 %v1061_v59, %v1061_v59 }
  0xfe   :  { %v455_v26 = vadd.f32 %v454_v24, %v453_v19  ;;  %v574_v27 = vadd.f32 %v573_v22, %v572_v16  ;;  %v577_v38 = vsel %vm57_vm0, %v525_v23, 0.0  ;;  %v468_v14 = vsel %vm57_vm0, %v1051_v45, 0.0 }
  0xff   :  { %v575_v29 = vsel %vm57_vm0, %v524_v25, 0.0  ;;  %v772_v30 = vpop.f32.mrb[16].mxu0  ;;  %v1114_v32 = vpop.f32.mrb[16].mxu1  ;;  %v589_v19 = vsel %vm57_vm0, %v531_v9, 0.0  ;;  %v533_v22 = vmul.f32 %v1059_v56, %v1059_v56  ;;  %v591_v23 = vsel %vm57_vm0, %v532_v11, 0.0 }
 0x100   :  { %v576_v33 = vadd.f32 %v575_v29, %v574_v27  ;;  %v318_v34 = vpop.f32.mrb[17].mxu0  ;;  %v457_v36 = vadd.f32 %v456_v28, %v455_v26  ;;  %v1116_v37 = vpop.f32.mrb[17].mxu1  ;;  %v527_v39 = vmul.f32 %v772_v30, %v772_v30  ;;  %v460_v44 = vsel %vm57_vm0, %v772_v30, 0.0 }
 0x101   :  { %v458_v40 = vsel %vm57_vm0, %v318_v34, 0.0  ;;  %v526_v41 = vmul.f32 %v318_v34, %v318_v34  ;;  %v534_v24 = vmul.f32 %v1068_v7, %v1068_v7  ;;  %v472_v45 = vsel %vm57_vm0, %v1059_v56, 0.0 }
 0x102   :  { %v459_v42 = vadd.f32 %v458_v40, %v457_v36  ;;  %v578_v43 = vadd.f32 %v577_v38, %v576_v33  ;;  %v581_v55 = vsel %vm57_vm0, %v527_v39, 0.0  ;;  %v474_v59 = vsel %vm57_vm0, %v1068_v7, 0.0 }
 0x103   :  { %v579_v47 = vsel %vm57_vm0, %v526_v41, 0.0  ;;  %v775_v48 = vpop.f32.mrb[18].mxu0  ;;  %v593_v29 = vsel %vm57_vm0, %v533_v22, 0.0  ;;  %v535_v30 = vmul.f32 %v1066_v3, %v1066_v3  ;;  %v595_v33 = vsel %vm57_vm0, %v534_v24, 0.0 }
 0x104   :  { %v580_v50 = vadd.f32 %v579_v47, %v578_v43  ;;  %v328_v52 = vpop.f32.mrb[19].mxu0  ;;  %v461_v53 = vadd.f32 %v460_v44, %v459_v42  ;;  %v529_v57 = vmul.f32 %v775_v48, %v775_v48  ;;  %v464_v0 = vsel %vm57_vm0, %v775_v48, 0.0 }
 0x105   :  { %v462_v58 = vsel %vm57_vm0, %v328_v52, 0.0  ;;  %v528_v60 = vmul.f32 %v328_v52, %v328_v52  ;;  %v536_v34 = vmul.f32 %v1076_v21, %v1076_v21  ;;  %v476_v56 = vsel %vm57_vm0, %v1066_v3, 0.0 }
 0x106   :  { %v463_v61 = vadd.f32 %v462_v58, %v461_v53  ;;  %v582_v62 = vadd.f32 %v581_v55, %v580_v50  ;;  %v585_v8 = vsel %vm57_vm0, %v529_v57, 0.0  ;;  %v478_v7 = vsel %vm57_vm0, %v1076_v21, 0.0 }
 0x107   :  { %v583_v1 = vsel %vm57_vm0, %v528_v60, 0.0  ;;  %v597_v41 = vsel %vm57_vm0, %v535_v30, 0.0  ;;  %v537_v42 = vmul.f32 %v1074_v17, %v1074_v17  ;;  %v599_v43 = vsel %vm57_vm0, %v536_v34, 0.0 }
 0x108   :  { %v465_v5 = vadd.f32 %v464_v0, %v463_v61  ;;  %v584_v6 = vadd.f32 %v583_v1, %v582_v62  ;;  %v538_v44 = vmul.f32 %v1084_v35, %v1084_v35  ;;  %v480_v3 = vsel %vm57_vm0, %v1074_v17, 0.0 }
 0x109   :  { %v482_v21 = vsel %vm57_vm0, %v1084_v35, 0.0  ;;  %v601_v53 = vsel %vm57_vm0, %v537_v42, 0.0  ;;  %v539_v54 = vmul.f32 %v1082_v31, %v1082_v31  ;;  %v540_v57 = vmul.f32 %v1092_v51, %v1092_v51 }
 0x10a   :  { %v586_v12 = vadd.f32 %v585_v8, %v584_v6  ;;  %v467_v13 = vadd.f32 %v466_v2, %v465_v5  ;;  %v603_v55 = vsel %vm57_vm0, %v538_v44, 0.0  ;;  %v484_v17 = vsel %vm57_vm0, %v1082_v31, 0.0 }
 0x10b   :  { %v486_v35 = vsel %vm57_vm0, %v1092_v51, 0.0  ;;  %v605_v0 = vsel %vm57_vm0, %v539_v54, 0.0  ;;  %v541_v1 = vmul.f32 %v1090_v46, %v1090_v46  ;;  %v607_v2 = vsel %vm57_vm0, %v540_v57, 0.0 }
 0x10c   :  { %v588_v16 = vadd.f32 %v587_v10, %v586_v12  ;;  %v469_v18 = vadd.f32 %v468_v14, %v467_v13  ;;  %v542_v5 = vmul.f32 %v1100_v4, %v1100_v4  ;;  %v488_v31 = vsel %vm57_vm0, %v1090_v46, 0.0 }
 0x10d   :  { %v490_v51 = vsel %vm57_vm0, %v1100_v4, 0.0  ;;  %v609_v11 = vsel %vm57_vm0, %v541_v1, 0.0  ;;  %v543_v12 = vmul.f32 %v1098_v63, %v1098_v63  ;;  %v544_v14 = vmul.f32 %v1108_v20, %v1108_v20 }
 0x10e   :  { %v471_v25 = vadd.f32 %v470_v49, %v469_v18  ;;  %v590_v26 = vadd.f32 %v589_v19, %v588_v16  ;;  %v611_v13 = vsel %vm57_vm0, %v542_v5, 0.0  ;;  %v492_v46 = vsel %vm57_vm0, %v1098_v63, 0.0 }
 0x10f   :  { %v494_v4 = vsel %vm57_vm0, %v1108_v20, 0.0  ;;  %v613_v22 = vsel %vm57_vm0, %v543_v12, 0.0  ;;  %v615_v24 = vsel %vm57_vm0, %v544_v14, 0.0  ;;  %v496_v63 = vsel %vm57_vm0, %v1106_v15, 0.0 }
 0x110   :  { %v592_v27 = vadd.f32 %v591_v23, %v590_v26  ;;  %v473_v28 = vadd.f32 %v472_v45, %v471_v25  ;;  %v545_v23 = vmul.f32 %v1106_v15, %v1106_v15  ;;  %v546_v25 = vmul.f32 %v1116_v37, %v1116_v37 }
 0x111   :  { %v498_v20 = vsel %vm57_vm0, %v1116_v37, 0.0 }
 0x112   :  { %v475_v36 = vadd.f32 %v474_v59, %v473_v28  ;;  %v594_v38 = vadd.f32 %v593_v29, %v592_v27  ;;  %v617_v28 = vsel %vm57_vm0, %v545_v23, 0.0  ;;  %v547_v29 = vmul.f32 %v1114_v32, %v1114_v32 }
 0x113   :  { %v619_v30 = vsel %vm57_vm0, %v546_v25, 0.0 }
 0x114   :  { %v596_v39 = vadd.f32 %v595_v33, %v594_v38  ;;  %v477_v40 = vadd.f32 %v476_v56, %v475_v36  ;;  %v500_v36 = vsel %vm57_vm0, %v1114_v32, 0.0  ;;  %v621_v15 = vsel %vm57_vm0, %v547_v29, 0.0 }
 0x116   :  { %v479_v47 = vadd.f32 %v478_v7, %v477_v40  ;;  %v598_v48 = vadd.f32 %v597_v41, %v596_v39 }
 0x118   :  { %v600_v50 = vadd.f32 %v599_v43, %v598_v48  ;;  %v481_v52 = vadd.f32 %v480_v3, %v479_v47 }
 0x11a   :  { %v483_v58 = vadd.f32 %v482_v21, %v481_v52  ;;  %v602_v60 = vadd.f32 %v601_v53, %v600_v50 }
 0x11c   :  { %v604_v61 = vadd.f32 %v603_v55, %v602_v60  ;;  %v485_v62 = vadd.f32 %v484_v17, %v483_v58 }
 0x11e   :  { %v487_v6 = vadd.f32 %v486_v35, %v485_v62  ;;  %v606_v8 = vadd.f32 %v605_v0, %v604_v61 }
 0x120   :  { %v608_v9 = vadd.f32 %v607_v2, %v606_v8  ;;  %v489_v10 = vadd.f32 %v488_v31, %v487_v6 }
 0x122   :  { %v491_v49 = vadd.f32 %v490_v51, %v489_v10  ;;  %v610_v16 = vadd.f32 %v609_v11, %v608_v9 }
 0x124   :  { %v612_v18 = vadd.f32 %v611_v13, %v610_v16  ;;  %v493_v19 = vadd.f32 %v492_v46, %v491_v49 }
 0x126   :  { %v495_v26 = vadd.f32 %v494_v4, %v493_v19  ;;  %v614_v45 = vadd.f32 %v613_v22, %v612_v18 }
 0x128   :  { %v616_v59 = vadd.f32 %v615_v24, %v614_v45  ;;  %v497_v27 = vadd.f32 %v496_v63, %v495_v26 }
 0x12a   :  { %v499_v33 = vadd.f32 %v498_v20, %v497_v27  ;;  %v618_v34 = vadd.f32 %v617_v28, %v616_v59 }
 0x12c   :  { %v501_v38 = vadd.f32 %v500_v36, %v499_v33  ;;  %v620_v56 = vadd.f32 %v619_v30, %v618_v34 }
 0x12e   :  { %v502_v7 = vrot.slane %v501_v38, 4  ;;  %v622_v37 = vadd.f32 %v621_v15, %v620_v56 }
 0x130   :  { %v503_v39 = vadd.f32 %v502_v7, %v501_v38  ;;  %v623_v40 = vrot.slane %v622_v37, 4 }
 0x132   :  { %v624_v41 = vadd.f32 %v623_v40, %v622_v37  ;;  %v504_v42 = vrot.slane %v503_v39, 2 }
 0x134   :  { %v505_v43 = vadd.f32 %v504_v42, %v503_v39  ;;  %v625_v44 = vrot.slane %v624_v41, 2 }
 0x136   :  { %v506_v47 = vrot.slane %v505_v43, 1  ;;  %v626_v48 = vadd.f32 %v625_v44, %v624_v41 }
 0x138   :  { %v507_v32 = vadd.f32 %v506_v47, %v505_v43  ;;  %v627_v3 = vrot.slane %v626_v48, 1 }
 0x13a   :  { %509 = vst.msk [vmem:[#allocation2] sm:$0x1] %vm508_vm1, %v507_v32  ;;  %v628_v21 = vadd.f32 %v627_v3, %v626_v48 }
 0x13b   :  { %828 = shalt.err (!%p825_p4)
}
 0x13c   :  { %s829_s19 = scalar_lea.hbm %s1253_s2, 16 }
 0x13d   :  { %p830_p5 = scmp.ne.s32.totalorder %s1253_s2, %s829_s19  ;;  %p833_p6 = scmp.lt.u32.totalorder %s829_s19, %s1253_s2 }
 0x13f   :  { %p835_p7 = pnand %p833_p6, %p830_p5 }
 0x141   :  { %838 = shalt.err (!%p835_p7)
}
 0x142   :  { %639 = dma.vmem_to_hbm [thread:$0]  %s637_s12, 16, %s1253_s2, [#allocation3]   ;;  %629 = vst.msk [vmem:[#allocation4] sm:$0x1] %vm508_vm1, %v628_v21 }
 0x143   :  { %s839_s25 = scalar_lea.vmem %s1218_s14, 16  ;;  %s843_s26 = scalar_lea.vmem %s1218_s14, 32 }
 0x144   :  { %p840_p8 = scmp.ne.s32.totalorder %s1218_s14, %s839_s25  ;;  %p844_p9 = scmp.lt.s32.totalorder %s1218_s14, %s1218_s14 }
 0x145   :  { %p845_p10 = scmp.lt.s32.totalorder %s843_s26, %s839_s25 }
 0x147   :  { %p846_p11 = por %p845_p10, %p844_p9 }
 0x149   :  { %p847_p12 = pnand %p846_p11, %p840_p8 }
 0x14b   :  { %850 = shalt.err (!%p847_p12)
}
 0x14c   :  { %s851_s29 = scalar_lea.hbm %s1254_s3, 16 }
 0x14d   :  { %p852_p13 = scmp.ne.s32.totalorder %s1254_s3, %s851_s29  ;;  %p855_p0 = scmp.lt.u32.totalorder %s851_s29, %s1254_s3 }
 0x14f   :  { %p857_p1 = pnand %p855_p0, %p852_p13 }
 0x151   :  { %860 = shalt.err (!%p857_p1)
}
 0x152   :  { %649 = dma.vmem_to_hbm [thread:$0]  %s1218_s14, 16, %s1254_s3, [#allocation5]  }
 0x153   :  { %861 = dma.done.wait [#allocation3], 16  }
 0x154   :  { %862 = vsyncadd [#allocation3], 4294967280 }
 0x155   :  { %863 = dma.done.wait [#allocation5], 16  }
 0x156   :  { %864 = vsyncadd [#allocation5], 4294967280 }
 0x157   :  { %656 = vsyncpa [#allocation3], 1 }
 0x158   :  { %657 = vsyncpa [#allocation5], 1 }

</bundles_post_ra>
